<compile_context>
chip_gen: v7x
topology: tpu7x:2x2x1
jax: 0.10.0
libtpu: 0.0.40
codegen_flags: <defaults>
</compile_context>

<pallas_src>
import functools

import jax
import jax.numpy as jnp
from jax.experimental import pallas as pl
from jax.experimental.pallas import tpu as pltpu


_LANE = 128


def _round_up(v, m):
    return (v + m - 1) // m * m


def _conv_mm_kernel(*refs, apply_shift, apply_relu, batched):
    # refs = (p_ref, w_ref[, shift_ref], o_ref)
    if apply_shift:
        p_ref, w_ref, shift_ref, o_ref = refs
    else:
        p_ref, w_ref, o_ref = refs
        shift_ref = None

    # (C_out, CKp) @ (CKp, tile) -> (C_out, tile), f32 accumulation on the MXU.
    p = p_ref[0] if batched else p_ref[...]
    y = jnp.dot(w_ref[...], p, preferred_element_type=jnp.float32)
    if apply_shift:
        y = y + shift_ref[...]            # (C_out, 1) broadcast over lanes (VPU, f32)
    if apply_relu:
        y = jnp.maximum(y, 0.0)
    y = y.astype(o_ref.dtype)
    if batched:
        o_ref[0] = y
    else:
        o_ref[...] = y


def _pick_lane_tile(lanes, ck, c_out, in_bytes, out_bytes, budget_bytes=16 << 20):
    """Pick a lane tile (multiple of 128 dividing `lanes`, which is a 128-multiple).

    VMEM-aware: the double-buffered input + output blocks for one tile must fit
    `budget_bytes` (kept well under v7x's 64 MiB / default scoped limits).
    Prefers >= 2 grid steps so v7x's second TensorCore gets work.
    """
    cands = [t for t in (4096, 2048, 1024, 512, 256, 128)
             if t <= lanes and lanes % t == 0]

    def blk_bytes(t):
        return 2 * ck * t * in_bytes + 2 * c_out * t * out_bytes

    fit = [t for t in cands if blk_bytes(t) <= budget_bytes]
    tile = fit[0] if fit else _LANE
    # Force at least 2 grid steps along the parallel lane axis when possible.
    if tile == lanes and lanes >= 2 * _LANE and (lanes // 2) % _LANE == 0:
        tile = lanes // 2
    return tile


def basic_conv1d(x, weight, bias=None, bn_params=None, *, stride=1, padding=0,
                 relu=False, bn=False, eps=1e-5, mxu_dtype=jnp.bfloat16):
    """Forward of BasicConv1D.

    x:        (B, C_in, N)
    weight:   (C_out, C_in, K)
    bias:     (C_out,) or None
    bn_params: dict(gamma, beta, running_mean, running_var), each (C_out,), or None
    mxu_dtype: dtype of the matmul operands (bf16 default; f32 for exact checks).
    """
    B, C_in, N = x.shape
    C_out, _, K = weight.shape
    N_out = (N + 2 * padding - K) // stride + 1
    CK = C_in * K

    # ---- fold conv bias + eval-mode BN into the weights / a per-channel shift ----
    w2d = weight.reshape(C_out, CK).astype(jnp.float32)
    apply_shift = bn or (bias is not None)
    if bn:
        gamma = bn_params["gamma"].astype(jnp.float32)
        beta = bn_params["beta"].astype(jnp.float32)
        mean = bn_params["running_mean"].astype(jnp.float32)
        var = bn_params["running_var"].astype(jnp.float32)
        scale = gamma * jax.lax.rsqrt(var + eps)                    # (C_out,)
        w2d = w2d * scale[:, None]                                  # fold BN scale into W
        b0 = (bias.astype(jnp.float32) if bias is not None
              else jnp.zeros((C_out,), jnp.float32))
        shift = beta + (b0 - mean) * scale                          # (C_out,)
    elif bias is not None:
        shift = bias.astype(jnp.float32)
    else:
        shift = None

    # ---- im2col windows (wrapper-side; fine at these sizes, see TODO above) ----
    x_pad = jnp.pad(x.astype(jnp.float32), ((0, 0), (0, 0), (padding, padding)))
    win = jnp.arange(K)[:, None] + stride * jnp.arange(N_out)[None, :]   # (K, N_out)
    patches = x_pad[:, :, win]                                           # (B, C_in, K, N_out)

    # Pad contraction dim to a bf16-sublane multiple; zero rows contribute 0 to the dot.
    CKp = _round_up(CK, 16)
    w2d = jnp.pad(w2d, ((0, 0), (0, CKp - CK))).astype(mxu_dtype)

    in_bytes = jnp.dtype(mxu_dtype).itemsize
    out_dtype = x.dtype
    out_bytes = jnp.dtype(out_dtype).itemsize

    operands_tail = [w2d]
    if apply_shift:
        operands_tail.append(shift.reshape(C_out, 1))

    # When the per-batch spatial extent is lane-dense, write (B, C_out, N_out) directly
    # (no post-kernel transpose). Otherwise fold batch into the lane axis and pad to 128.
    batched_layout = (N_out % _LANE == 0)

    if batched_layout:
        Np = N_out
        p_op = patches.reshape(B, CK, N_out)
        p_op = jnp.pad(p_op, ((0, 0), (0, CKp - CK), (0, 0))).astype(mxu_dtype)
        tile = _pick_lane_tile(Np, CKp, C_out, in_bytes, out_bytes)
        grid = (B, Np // tile)
        in_specs = [pl.BlockSpec((1, CKp, tile), lambda b, i: (b, 0, i)),
                    pl.BlockSpec((C_out, CKp), lambda b, i: (0, 0))]
        if apply_shift:
            in_specs.append(pl.BlockSpec((C_out, 1), lambda b, i: (0, 0)))
        out_specs = pl.BlockSpec((1, C_out, tile), lambda b, i: (b, 0, i))
        out_shape = jax.ShapeDtypeStruct((B, C_out, Np), out_dtype)
        semantics = ("parallel", "parallel")
        total_lanes = B * Np
    else:
        L = B * N_out
        Lp = _round_up(L, _LANE)
        p_op = patches.transpose(1, 2, 0, 3).reshape(CK, L)
        p_op = jnp.pad(p_op, ((0, CKp - CK), (0, Lp - L))).astype(mxu_dtype)
        tile = _pick_lane_tile(Lp, CKp, C_out, in_bytes, out_bytes)
        grid = (Lp // tile,)
        in_specs = [pl.BlockSpec((CKp, tile), lambda i: (0, i)),
                    pl.BlockSpec((C_out, CKp), lambda i: (0, 0))]
        if apply_shift:
            in_specs.append(pl.BlockSpec((C_out, 1), lambda i: (0, 0)))
        out_specs = pl.BlockSpec((C_out, tile), lambda i: (0, i))
        out_shape = jax.ShapeDtypeStruct((C_out, Lp), out_dtype)
        semantics = ("parallel",)
        total_lanes = Lp

    kernel = functools.partial(_conv_mm_kernel, apply_shift=apply_shift,
                               apply_relu=relu, batched=batched_layout)

    # VMEM budget: double-buffered input/output lane blocks + resident weight/shift.
    block_bytes = 2 * CKp * tile * in_bytes + 2 * C_out * tile * out_bytes
    const_bytes = 2 * C_out * CKp * in_bytes + 2 * C_out * _LANE * 4
    vmem_limit = int(min(64 << 20, max(32 << 20, 2 * (block_bytes + const_bytes))))

    cost = pl.CostEstimate(
        flops=int(2 * C_out * CKp * total_lanes),
        transcendentals=0,
        bytes_accessed=int(p_op.size * in_bytes + w2d.size * in_bytes
                           + (C_out * 4 if apply_shift else 0)
                           + C_out * total_lanes * out_bytes),
    )

    y = pl.pallas_call(
        kernel,
        out_shape=out_shape,
        grid=grid,
        in_specs=in_specs,
        out_specs=out_specs,
        compiler_params=pltpu.CompilerParams(
            dimension_semantics=semantics,
            vmem_limit_bytes=vmem_limit),
        cost_estimate=cost,
    )(p_op, *operands_tail)

    if batched_layout:
        return y                                        # already (B, C_out, N_out)
    L = B * N_out
    return y[:, :L].reshape(C_out, B, N_out).transpose(1, 0, 2)


def _reference(x, weight, bias, bn_params, *, stride, padding, relu, bn, eps=1e-5):
    out = jax.lax.conv_general_dilated(
        x, weight, window_strides=(stride,), padding=[(padding, padding)],
        dimension_numbers=("NCH", "OIH", "NCH"))
    if bias is not None:
        out = out + bias[None, :, None]
    if bn:
        g = bn_params["gamma"][None, :, None]
        be = bn_params["beta"][None, :, None]
        m = bn_params["running_mean"][None, :, None]
        v = bn_params["running_var"][None, :, None]
        out = (out - m) / jnp.sqrt(v + eps) * g + be
    if relu:
        out = jnp.maximum(out, 0.0)
    return out


if __name__ == "__main__":
    key = jax.random.PRNGKey(0)
    kx, kw, kg, kb, km, kv, kb2, kx3, kw3 = jax.random.split(key, 9)

    # Module config: BasicConv1D(in_c=4, out_c=8, kernel_size=3, padding=1,
    #                            relu=True, bn=True, bias=False)
    B, C_in, N = 2, 4, 16
    C_out, K, padding = 8, 3, 1

    x = jax.random.normal(kx, (B, C_in, N), dtype=jnp.float32)
    weight = jax.random.normal(kw, (C_out, C_in, K), dtype=jnp.float32) * 0.2
    bn_params = {
        "gamma": 1.0 + 0.1 * jax.random.normal(kg, (C_out,), dtype=jnp.float32),
        "beta": 0.1 * jax.random.normal(kb, (C_out,), dtype=jnp.float32),
        "running_mean": 0.1 * jax.random.normal(km, (C_out,), dtype=jnp.float32),
        "running_var": jnp.abs(1.0 + 0.1 * jax.random.normal(kv, (C_out,), dtype=jnp.float32)),
    }

    # Path 1: conv + BN + ReLU, bf16 MXU operands (default). Tolerance reflects the
    # expected bf16-operand rounding level vs the f32 reference.
    out = basic_conv1d(x, weight, None, bn_params,
                       stride=1, padding=padding, relu=True, bn=True)
    out = jax.block_until_ready(out)
    ref = _reference(x, weight, None, bn_params,
                     stride=1, padding=padding, relu=True, bn=True)
    assert out.shape == (B, C_out, N)
    assert jnp.allclose(out, ref, atol=5e-2, rtol=5e-2), "mismatch vs reference (bn+relu, bf16)"

    # Path 2: plain conv, no bias / BN / ReLU, stride=2 — f32 MXU operands to verify
    # exact semantics of the no-shift path, strided windowing and lane padding.
    out2 = basic_conv1d(x, weight, None, None,
                        stride=2, padding=0, relu=False, bn=False,
                        mxu_dtype=jnp.float32)
    out2 = jax.block_until_ready(out2)
    ref2 = _reference(x, weight, None, None,
                      stride=2, padding=0, relu=False, bn=False)
    assert out2.shape == ref2.shape
    assert jnp.allclose(out2, ref2, atol=1e-4, rtol=1e-4), "mismatch vs reference (plain conv, f32)"

    # Path 3: N_out is a 128-multiple -> batched direct-NCW layout (no post transpose),
    # conv + bias + ReLU, bf16 operands.
    N3 = 128
    x3 = jax.random.normal(kx3, (B, C_in, N3), dtype=jnp.float32)
    w3 = jax.random.normal(kw3, (C_out, C_in, K), dtype=jnp.float32) * 0.2
    bias3 = 0.1 * jax.random.normal(kb2, (C_out,), dtype=jnp.float32)
    out3 = basic_conv1d(x3, w3, bias3, None,
                        stride=1, padding=1, relu=True, bn=False)
    out3 = jax.block_until_ready(out3)
    ref3 = _reference(x3, w3, bias3, None,
                      stride=1, padding=1, relu=True, bn=False)
    assert out3.shape == (B, C_out, N3)
    assert jnp.allclose(out3, ref3, atol=5e-2, rtol=5e-2), "mismatch vs reference (batched layout)"

    print("KERNEL_OK")
</pallas_src>

<mosaic_0001>
module attributes {stable_mosaic.version = 11 : i64} {
  func.func @_conv_mm_kernel(%arg0: i32, %arg1: memref<16x128xbf16, #tpu.memory_space<vmem>>, %arg2: memref<8x16xbf16, #tpu.memory_space<vmem>>, %arg3: memref<8x1xf32, #tpu.memory_space<vmem>>, %arg4: memref<8x128xf32, #tpu.memory_space<vmem>>) attributes {dimension_semantics = [#tpu.dimension_semantics<parallel>], iteration_bounds = array<i64: 1>, scalar_prefetch = 0 : i64, scratch_operands = 0 : i64, tpu.core_type = #tpu.core_type<tc>, window_params = [{transform_indices = @transform_0, window_bounds = array<i64: 16, 128>}, {pipeline_mode = #tpu.pipeline_mode<synchronous>, transform_indices = @transform_1, window_bounds = array<i64: 8, 16>}, {pipeline_mode = #tpu.pipeline_mode<synchronous>, transform_indices = @transform_2, window_bounds = array<i64: 8, 1>}, {transform_indices = @transform_3, window_bounds = array<i64: 8, 128>}]} {
    %c0 = arith.constant 0 : index
    %c0_0 = arith.constant 0 : index
    %0 = vector.load %arg1[%c0, %c0_0] : memref<16x128xbf16, #tpu.memory_space<vmem>>, vector<16x128xbf16>
    %c0_1 = arith.constant 0 : index
    %c0_2 = arith.constant 0 : index
    %1 = vector.load %arg2[%c0_1, %c0_2] : memref<8x16xbf16, #tpu.memory_space<vmem>>, vector<8x16xbf16>
    %cst = arith.constant dense<0.000000e+00> : vector<8x128xf32>
    %2 = tpu.matmul %1, %0, %cst {dimension_numbers = #tpu.dot_dimension_numbers<[1], [0], [0], [1], [0, 0, 1, 1], [], []>} : vector<8x16xbf16>, vector<16x128xbf16>, vector<8x128xf32> -> vector<8x128xf32>
    %c0_3 = arith.constant 0 : index
    %c0_4 = arith.constant 0 : index
    %3 = vector.load %arg3[%c0_3, %c0_4] : memref<8x1xf32, #tpu.memory_space<vmem>>, vector<8x1xf32>
    %4 = vector.broadcast %3 : vector<8x1xf32> to vector<8x128xf32>
    %5 = arith.addf %2, %4 : vector<8x128xf32>
    %cst_5 = arith.constant 0.000000e+00 : f32
    %6 = vector.broadcast %cst_5 : f32 to vector<8x128xf32>
    %7 = arith.maximumf %5, %6 : vector<8x128xf32>
    %c0_6 = arith.constant 0 : index
    %c0_7 = arith.constant 0 : index
    %8 = vector.load %arg4[%c0_6, %c0_7] : memref<8x128xf32, #tpu.memory_space<vmem>>, vector<8x128xf32>
    tpu.vector_store %arg4[%c0_6, %c0_7], %7 {strides = array<i32>} : memref<8x128xf32, #tpu.memory_space<vmem>>, vector<8x128xf32>,
    return
  }
  func.func @transform_0(%arg0: i32) -> (i32, i32) {
    %c0_i32 = arith.constant 0 : i32
    %c0_i32_0 = arith.constant 0 : i32
    return %c0_i32, %arg0 : i32, i32
  }
  func.func @transform_1(%arg0: i32) -> (i32, i32) {
    %c0_i32 = arith.constant 0 : i32
    %c0_i32_0 = arith.constant 0 : i32
    %c0_i32_1 = arith.constant 0 : i32
    return %c0_i32, %c0_i32_0 : i32, i32
  }
  func.func @transform_2(%arg0: i32) -> (i32, i32) {
    %c0_i32 = arith.constant 0 : i32
    %c0_i32_0 = arith.constant 0 : i32
    %c0_i32_1 = arith.constant 0 : i32
    return %c0_i32, %c0_i32_0 : i32, i32
  }
  func.func @transform_3(%arg0: i32) -> (i32, i32) {
    %c0_i32 = arith.constant 0 : i32
    %c0_i32_0 = arith.constant 0 : i32
    return %c0_i32, %arg0 : i32, i32
  }
}

</mosaic_0001>

<bundles_post_ra>
// kernel: tpu_custom_call.1
= control target key start
LH: loop header
LB: loop body
LE: loop exit
PB: predicated region body
PF: predicated region fallthrough
CT: control target
= control target key end

     0   :  { %v131_v1 = vmov 0.0   ;;  %vm132_vm0 = vmmov 0   ;;  %vm31_vm1 = vcmask 130048   ;;  %s176_s0 = inlined_call_operand.vmem [shape: bf16[16,128], index: 0, kind: input, shape index: {}]   ;;  %s177_s1 = inlined_call_operand.vmem [shape: bf16[8,16], index: 1, kind: input, shape index: {}]   ;;  %s178_s2 = inlined_call_operand.vmem [shape: f32[8,1], index: 2, kind: input, shape index: {}]   ;;  %s179_s3 = inlined_call_operand.hbm [shape: f32[8,128], index: 3, kind: output, shape index: {}]  }
   0x1   :  { %v106_v0 = vld [vmem:[%s176_s0] sm:$0xff]   ;;  %95 = vmatprep.subr.bf16.mxu0 %v131_v1  ;;  %97 = vmatprep.mubr.msk.bf16.mxu0 %vm132_vm0, %v131_v1 }
   0x2   :  { %v19_v2 = vld [vmem:[%s178_s2] sm:$0xff]  ;;  %96 = vmatpush3.bf16.msra.mxu0 %v106_v0 }
   0x3   :  { %v18_v3 = vld [vmem:[%s177_s1] sm:$0xf] }
   0x4   :  { %8 = vsyncpa [#allocation3], 0  ;;  %v133_v4 = vmov 0   ;;  %s134_s0 = smov [#allocation2]  }
   0x5   :  { %105 = vset.pattern.permute.xlu0 %v133_v4  ;;  %98 = vmatmul.mubr.msk.bf16.vlgmr.msra.gmra.mrb[0].mxu0 %vm31_vm1, %v18_v3  ;;  %s83_s18 = sshll.u32 %s134_s0, 4  ;;  %s84_s18 = int_to_ptr.vmem [resolvable:$true] %s83_s18 }
   0x6   :  { %22 = vperm.xlu0 %105, %v19_v2   ;;  %s107_s2 = scalar_lea.vmem %s84_s18, 128  ;;  %p112_p1 = scmp.lt.s32.totalorder %s84_s18, %s84_s18 }
   0x7   :  { %p108_p0 = scmp.ne.s32.totalorder %s84_s18, %s107_s2  ;;  %p113_p2 = scmp.lt.s32.totalorder %s107_s2, %s107_s2 }
   0x9   :  { %p114_p3 = por %p113_p2, %p112_p1 }
   0xb   :  { %p115_p4 = pnand %p114_p3, %p108_p0 }
  0x85   :  { %v23_v5 = vpop.permute.xlu0 %22 }
  0xd8   :  { %v69_v6 = vpop.f32.mrb[0].mxu0 }
  0xd9   :  { %v70_v7 = vadd.f32 %v69_v6, %v23_v5  ;;  %v99_v8 = vpop.f32.mrb[1].mxu0 }
  0xda   :  { %v72_v9 = vpop.f32.mrb[2].mxu0 }
  0xdb   :  { %v75_v10 = vmax.f32 %v70_v7, 0.0  ;;  %v100_v11 = vpop.f32.mrb[3].mxu0 }
  0xdd   :  { %76 = vst [vmem:[#allocation2] sm:$0xff] %v75_v10 }
  0xde   :  { %118 = shalt.err (!%p115_p4)
}
  0xdf   :  { %s119_s20 = scalar_lea.hbm %s179_s3, 128 }
  0xe0   :  { %p120_p5 = scmp.ne.s32.totalorder %s179_s3, %s119_s20  ;;  %p123_p6 = scmp.lt.u32.totalorder %s119_s20, %s179_s3 }
  0xe2   :  { %p125_p7 = pnand %p123_p6, %p120_p5 }
  0xe4   :  { %128 = shalt.err (!%p125_p7)
}
  0xe5   :  { %86 = dma.vmem_to_hbm [thread:$0]  %s84_s18, 128, %s179_s3, [#allocation3]  }
  0xe6   :  { %129 = dma.done.wait [#allocation3], 128  }
  0xe7   :  { %130 = vsyncadd [#allocation3], 4294967168 }
  0xe8   :  { %90 = vsyncpa [#allocation3], 1 }

</bundles_post_ra>
